<compile_context>
chip_gen: v7x
topology: tpu7x:2x2x1
jax: 0.10.0
libtpu: 0.0.40
codegen_flags: <defaults>
</compile_context>

<pallas_src>
import functools

import numpy as np
import jax
import jax.numpy as jnp
from jax import lax
from jax.experimental import pallas as pl
from jax.experimental.pallas import tpu as pltpu

_E = float(np.e)
_BRANCH = -1.0 / _E          # Lambert W branch point
_LANES = 128


def _round_up(x, m):
    return -(-x // m) * m


def _lambertw_w0(z, iters=4):
    """Principal-branch Lambert W for z >= -1/e (elementwise, float32)."""
    z = z.astype(jnp.float32)

    # Series around the branch point z = -1/e (exact -1 at the SuperLoss clamp).
    p = jnp.sqrt(jnp.maximum(2.0 * (_E * z + 1.0), 0.0))
    w_series = -1.0 + p * (1.0 + p * (-1.0 / 3.0
                                      + p * (11.0 / 72.0 + p * (-43.0 / 540.0))))
    near_branch = z < jnp.float32(_BRANCH + 1e-4)
    # Freeze near-branch lanes at z=0 so Halley never divides by ~0 there;
    # their final value is taken from the series (selected at the end).
    zi = jnp.where(near_branch, jnp.float32(0.0), z)

    # Initial guess (branchless, computed once):
    zc = jnp.maximum(zi, jnp.float32(1e-6))
    L1 = jnp.log(zc)
    L2 = jnp.log(jnp.maximum(L1, jnp.float32(1e-6)))
    w_log = L1 - L2 + L2 / L1                      # good for z > 3
    w_mid = zi / (1.0 + zi)                        # good for -0.25 < z <= 3
    w = jnp.where(zi < -0.25, w_series, jnp.where(zi > 3.0, w_log, w_mid))

    # Halley iterations (cubic): one exp + one approx reciprocal per step.
    for _ in range(iters):
        ew = jnp.exp(w)
        f = w * ew - zi
        wp1 = jnp.maximum(w + 1.0, jnp.float32(1e-5))
        denom = 2.0 * ew * wp1 * wp1 - (w + 2.0) * f
        w = w - (2.0 * f * wp1) * pl.reciprocal(denom, approx=True)

    return jnp.where(near_branch, w_series, w)


def _superloss_kernel(l_ref, out_ref, acc_ref, *, tau, lam, n, block_rows):
    i = pl.program_id(0)

    @pl.when(i == 0)
    def _():
        acc_ref[...] = jnp.zeros_like(acc_ref)

    l = l_ref[...].astype(jnp.float32)                         # (block_rows, 128)
    # sigma is computed on l_i.detach() in the original; forward value identical.
    # TODO(synk): the detach only affects autodiff (sigma treated as constant),
    #             the forward value implemented here is identical.
    x = jnp.float32(-2.0 / _E)
    y = 0.5 * jnp.maximum(x, (l - tau) * jnp.float32(1.0 / lam))
    w = _lambertw_w0(y)
    sigma = jnp.exp(-w)
    # log(sigma) == -w exactly, so lam*log(sigma)**2 == lam*w*w (cheaper, exact).
    loss = (l - tau) * sigma + jnp.float32(lam) * (w * w)

    # Mask padded elements (global flat index >= n).
    rows = lax.broadcasted_iota(jnp.int32, loss.shape, 0)
    lanes = lax.broadcasted_iota(jnp.int32, loss.shape, 1)
    gidx = (i * block_rows + rows) * _LANES + lanes
    loss = jnp.where(gidx < n, loss, jnp.float32(0.0))

    # Fold (block_rows,128) -> (8,128) partial sums and accumulate (VPU only);
    # the single cross-lane/sublane reduce happens once, at the last grid step.
    part = jnp.sum(loss.reshape(block_rows // 8, 8, _LANES), axis=0)
    acc_ref[...] += part

    @pl.when(i == pl.num_programs(0) - 1)
    def _():
        out_ref[0, 0] = jnp.sum(acc_ref[...]) * jnp.float32(1.0 / n)


def super_loss(l_i, C, lam=0.25, block_rows=256):
    """Pallas implementation of SuperLoss.forward. l_i: array of per-sample losses."""
    tau = float(np.log(float(C)))
    n = int(l_i.size)

    rows = -(-n // _LANES)                  # rows of 128 lanes
    rows8 = _round_up(max(rows, 1), 8)      # sublane-aligned row count
    blk = _round_up(min(block_rows, rows8), 8)
    total_rows = _round_up(rows8, blk)
    padded = total_rows * _LANES

    lf = jnp.ravel(l_i)                     # keep caller dtype; cast in-kernel
    if padded > n:
        lf = jnp.pad(lf, (0, padded - n))   # pad value irrelevant: masked in-kernel
    l2d = lf.reshape(total_rows, _LANES)

    kernel = functools.partial(_superloss_kernel, tau=tau, lam=float(lam),
                               n=n, block_rows=blk)
    out = pl.pallas_call(
        kernel,
        out_shape=jax.ShapeDtypeStruct((1, 1), jnp.float32),
        grid=(total_rows // blk,),
        in_specs=[pl.BlockSpec((blk, _LANES), lambda i: (i, 0))],
        out_specs=pl.BlockSpec((1, 1), lambda i: (0, 0),
                               memory_space=pltpu.MemorySpace.SMEM),
        scratch_shapes=[pltpu.VMEM((8, _LANES), jnp.float32)],
        compiler_params=pltpu.CompilerParams(
            dimension_semantics=("arbitrary",)),
    )(l2d)
    return out[0, 0]


# ---------------- numpy float64 reference (for sanity check) -----------------
def _np_lambertw_w0(z, iters=40):
    z = np.asarray(z, np.float64)
    at_branch = z <= _BRANCH + 1e-12
    z_safe = np.where(at_branch, 0.0, z)
    p = np.sqrt(np.maximum(2.0 * (_E * z_safe + 1.0), 0.0))
    w_branch = -1.0 + p - (p * p) / 3.0 + (11.0 / 72.0) * p ** 3
    zc = np.maximum(z_safe, 1e-12)
    L1 = np.log(zc)
    L2 = np.log(np.maximum(L1, 1e-12))
    w_log = L1 - L2 + L2 / L1
    w_mid = z_safe / (1.0 + z_safe)
    w = np.where(z_safe < -0.25, w_branch, np.where(z_safe > 3.0, w_log, w_mid))
    for _ in range(iters):
        ew = np.exp(w)
        f = w * ew - z_safe
        wp1 = w + 1.0
        w = w - f / (ew * wp1 - (w + 2.0) * f / (2.0 * wp1))
    return np.where(at_branch, -1.0, w)


def _np_superloss(l_i, C, lam=0.25):
    l = np.asarray(l_i, np.float64)
    tau = np.log(float(C))
    y = 0.5 * np.maximum(-2.0 / _E, (l - tau) / lam)
    sigma = np.exp(-_np_lambertw_w0(y))
    loss = (l - tau) * sigma + lam * np.log(sigma) ** 2
    return float(loss.mean())


if __name__ == "__main__":
    key = jax.random.PRNGKey(0)
    N = 64          # batch of per-sample losses
    C = 10          # number of classes -> tau = log(10)
    lam = 0.25
    # per-sample cross-entropy-like losses (positive); many hit the -1/e clamp
    l_i = jax.random.uniform(key, (N,), jnp.float32, minval=0.0, maxval=5.0)

    out = super_loss(l_i, C=C, lam=lam)
    out = jax.block_until_ready(out)

    ref = _np_superloss(np.asarray(l_i), C, lam)
    assert abs(float(out) - ref) <= 1e-3 * max(1.0, abs(ref)), (float(out), ref)
    print("KERNEL_OK")
</pallas_src>

<mosaic_0001>
module attributes {stable_mosaic.version = 11 : i64} {
  func.func @_superloss_kernel(%arg0: i32, %arg1: memref<8x128xf32, #tpu.memory_space<vmem>>, %arg2: memref<1x1xf32, #tpu.memory_space<smem>>, %arg3: memref<8x128xf32, #tpu.memory_space<vmem>>) attributes {dimension_semantics = [#tpu.dimension_semantics<arbitrary>], iteration_bounds = array<i64: 1>, scalar_prefetch = 0 : i64, scratch_operands = 1 : i64, tpu.core_type = #tpu.core_type<tc>, window_params = [{transform_indices = @transform_0, window_bounds = array<i64: 8, 128>}, {transform_indices = @transform_1, window_bounds = array<i64: 1, 1>}]} {
    %c0_i32 = arith.constant 0 : i32
    %0 = arith.cmpi eq, %arg0, %c0_i32 : i32
    %1 = arith.extui %0 : i1 to i32
    %c0_i32_0 = arith.constant 0 : i32
    %2 = arith.cmpi ne, %1, %c0_i32_0 : i32
    scf.if %2 {
      %cst_52 = arith.constant 0.000000e+00 : f32
      %171 = vector.broadcast %cst_52 : f32 to vector<8x128xf32>
      %c0_53 = arith.constant 0 : index
      %c0_54 = arith.constant 0 : index
      %172 = vector.load %arg3[%c0_53, %c0_54] : memref<8x128xf32, #tpu.memory_space<vmem>>, vector<8x128xf32>
      tpu.vector_store %arg3[%c0_53, %c0_54], %171 {strides = array<i32>} : memref<8x128xf32, #tpu.memory_space<vmem>>, vector<8x128xf32>,
    } else {
    }
    %c0 = arith.constant 0 : index
    %c0_1 = arith.constant 0 : index
    %3 = vector.load %arg1[%c0, %c0_1] : memref<8x128xf32, #tpu.memory_space<vmem>>, vector<8x128xf32>
    %cst = arith.constant 2.30258512 : f32
    %4 = vector.broadcast %cst : f32 to vector<8x128xf32>
    %5 = arith.subf %3, %4 : vector<8x128xf32>
    %cst_2 = arith.constant 4.000000e+00 : f32
    %6 = vector.broadcast %cst_2 : f32 to vector<8x128xf32>
    %7 = arith.mulf %5, %6 : vector<8x128xf32>
    %cst_3 = arith.constant -0.735758901 : f32
    %8 = vector.broadcast %cst_3 : f32 to vector<8x128xf32>
    %9 = arith.maximumf %8, %7 : vector<8x128xf32>
    %cst_4 = arith.constant 5.000000e-01 : f32
    %10 = vector.broadcast %cst_4 : f32 to vector<8x128xf32>
    %11 = arith.mulf %10, %9 : vector<8x128xf32>
    %cst_5 = arith.constant 2.71828175 : f32
    %12 = vector.broadcast %cst_5 : f32 to vector<8x128xf32>
    %13 = arith.mulf %12, %11 : vector<8x128xf32>
    %cst_6 = arith.constant 1.000000e+00 : f32
    %14 = vector.broadcast %cst_6 : f32 to vector<8x128xf32>
    %15 = arith.addf %13, %14 : vector<8x128xf32>
    %cst_7 = arith.constant 2.000000e+00 : f32
    %16 = vector.broadcast %cst_7 : f32 to vector<8x128xf32>
    %17 = arith.mulf %16, %15 : vector<8x128xf32>
    %cst_8 = arith.constant 0.000000e+00 : f32
    %18 = vector.broadcast %cst_8 : f32 to vector<8x128xf32>
    %19 = arith.maximumf %17, %18 : vector<8x128xf32>
    %20 = math.sqrt %19 : vector<8x128xf32>
    %cst_9 = arith.constant -0.0796296298 : f32
    %21 = vector.broadcast %cst_9 : f32 to vector<8x128xf32>
    %22 = arith.mulf %20, %21 : vector<8x128xf32>
    %cst_10 = arith.constant 0.152777776 : f32
    %23 = vector.broadcast %cst_10 : f32 to vector<8x128xf32>
    %24 = arith.addf %23, %22 : vector<8x128xf32>
    %25 = arith.mulf %20, %24 : vector<8x128xf32>
    %cst_11 = arith.constant -0.333333343 : f32
    %26 = vector.broadcast %cst_11 : f32 to vector<8x128xf32>
    %27 = arith.addf %26, %25 : vector<8x128xf32>
    %28 = arith.mulf %20, %27 : vector<8x128xf32>
    %cst_12 = arith.constant 1.000000e+00 : f32
    %29 = vector.broadcast %cst_12 : f32 to vector<8x128xf32>
    %30 = arith.addf %29, %28 : vector<8x128xf32>
    %31 = arith.mulf %20, %30 : vector<8x128xf32>
    %cst_13 = arith.constant -1.000000e+00 : f32
    %32 = vector.broadcast %cst_13 : f32 to vector<8x128xf32>
    %33 = arith.addf %32, %31 : vector<8x128xf32>
    %cst_14 = arith.constant -0.367779434 : f32
    %34 = vector.broadcast %cst_14 : f32 to vector<8x128xf32>
    %35 = arith.cmpf olt, %11, %34 : vector<8x128xf32>
    %cst_15 = arith.constant 0.000000e+00 : f32
    %36 = vector.broadcast %cst_15 : f32 to vector<8x128xf32>
    %37 = arith.select %35, %36, %11 : vector<8x128xi1>, vector<8x128xf32>
    %cst_16 = arith.constant 9.99999997E-7 : f32
    %38 = vector.broadcast %cst_16 : f32 to vector<8x128xf32>
    %39 = arith.maximumf %37, %38 : vector<8x128xf32>
    %40 = math.log %39 : vector<8x128xf32>
    %cst_17 = arith.constant 9.99999997E-7 : f32
    %41 = vector.broadcast %cst_17 : f32 to vector<8x128xf32>
    %42 = arith.maximumf %40, %41 : vector<8x128xf32>
    %43 = math.log %42 : vector<8x128xf32>
    %44 = arith.subf %40, %43 : vector<8x128xf32>
    %45 = arith.divf %43, %40 : vector<8x128xf32>
    %46 = arith.addf %44, %45 : vector<8x128xf32>
    %cst_18 = arith.constant 1.000000e+00 : f32
    %47 = vector.broadcast %cst_18 : f32 to vector<8x128xf32>
    %48 = arith.addf %47, %37 : vector<8x128xf32>
    %49 = arith.divf %37, %48 : vector<8x128xf32>
    %cst_19 = arith.constant -2.500000e-01 : f32
    %50 = vector.broadcast %cst_19 : f32 to vector<8x128xf32>
    %51 = arith.cmpf olt, %37, %50 : vector<8x128xf32>
    %cst_20 = arith.constant 3.000000e+00 : f32
    %52 = vector.broadcast %cst_20 : f32 to vector<8x128xf32>
    %53 = arith.cmpf ogt, %37, %52 : vector<8x128xf32>
    %54 = arith.select %53, %46, %49 : vector<8x128xi1>, vector<8x128xf32>
    %55 = arith.select %51, %33, %54 : vector<8x128xi1>, vector<8x128xf32>
    %56 = math.exp %55 : vector<8x128xf32>
    %57 = arith.mulf %55, %56 : vector<8x128xf32>
    %58 = arith.subf %57, %37 : vector<8x128xf32>
    %cst_21 = arith.constant 1.000000e+00 : f32
    %59 = vector.broadcast %cst_21 : f32 to vector<8x128xf32>
    %60 = arith.addf %55, %59 : vector<8x128xf32>
    %cst_22 = arith.constant 9.99999974E-6 : f32
    %61 = vector.broadcast %cst_22 : f32 to vector<8x128xf32>
    %62 = arith.maximumf %60, %61 : vector<8x128xf32>
    %cst_23 = arith.constant 2.000000e+00 : f32
    %63 = vector.broadcast %cst_23 : f32 to vector<8x128xf32>
    %64 = arith.mulf %63, %56 : vector<8x128xf32>
    %65 = arith.mulf %64, %62 : vector<8x128xf32>
    %66 = arith.mulf %65, %62 : vector<8x128xf32>
    %cst_24 = arith.constant 2.000000e+00 : f32
    %67 = vector.broadcast %cst_24 : f32 to vector<8x128xf32>
    %68 = arith.addf %55, %67 : vector<8x128xf32>
    %69 = arith.mulf %68, %58 : vector<8x128xf32>
    %70 = arith.subf %66, %69 : vector<8x128xf32>
    %cst_25 = arith.constant 2.000000e+00 : f32
    %71 = vector.broadcast %cst_25 : f32 to vector<8x128xf32>
    %72 = arith.mulf %71, %58 : vector<8x128xf32>
    %73 = arith.mulf %72, %62 : vector<8x128xf32>
    %74 = tpu.reciprocal %70 {approx = true} : vector<8x128xf32> -> vector<8x128xf32>
    %75 = arith.mulf %73, %74 : vector<8x128xf32>
    %76 = arith.subf %55, %75 : vector<8x128xf32>
    %77 = math.exp %76 : vector<8x128xf32>
    %78 = arith.mulf %76, %77 : vector<8x128xf32>
    %79 = arith.subf %78, %37 : vector<8x128xf32>
    %cst_26 = arith.constant 1.000000e+00 : f32
    %80 = vector.broadcast %cst_26 : f32 to vector<8x128xf32>
    %81 = arith.addf %76, %80 : vector<8x128xf32>
    %cst_27 = arith.constant 9.99999974E-6 : f32
    %82 = vector.broadcast %cst_27 : f32 to vector<8x128xf32>
    %83 = arith.maximumf %81, %82 : vector<8x128xf32>
    %cst_28 = arith.constant 2.000000e+00 : f32
    %84 = vector.broadcast %cst_28 : f32 to vector<8x128xf32>
    %85 = arith.mulf %84, %77 : vector<8x128xf32>
    %86 = arith.mulf %85, %83 : vector<8x128xf32>
    %87 = arith.mulf %86, %83 : vector<8x128xf32>
    %cst_29 = arith.constant 2.000000e+00 : f32
    %88 = vector.broadcast %cst_29 : f32 to vector<8x128xf32>
    %89 = arith.addf %76, %88 : vector<8x128xf32>
    %90 = arith.mulf %89, %79 : vector<8x128xf32>
    %91 = arith.subf %87, %90 : vector<8x128xf32>
    %cst_30 = arith.constant 2.000000e+00 : f32
    %92 = vector.broadcast %cst_30 : f32 to vector<8x128xf32>
    %93 = arith.mulf %92, %79 : vector<8x128xf32>
    %94 = arith.mulf %93, %83 : vector<8x128xf32>
    %95 = tpu.reciprocal %91 {approx = true} : vector<8x128xf32> -> vector<8x128xf32>
    %96 = arith.mulf %94, %95 : vector<8x128xf32>
    %97 = arith.subf %76, %96 : vector<8x128xf32>
    %98 = math.exp %97 : vector<8x128xf32>
    %99 = arith.mulf %97, %98 : vector<8x128xf32>
    %100 = arith.subf %99, %37 : vector<8x128xf32>
    %cst_31 = arith.constant 1.000000e+00 : f32
    %101 = vector.broadcast %cst_31 : f32 to vector<8x128xf32>
    %102 = arith.addf %97, %101 : vector<8x128xf32>
    %cst_32 = arith.constant 9.99999974E-6 : f32
    %103 = vector.broadcast %cst_32 : f32 to vector<8x128xf32>
    %104 = arith.maximumf %102, %103 : vector<8x128xf32>
    %cst_33 = arith.constant 2.000000e+00 : f32
    %105 = vector.broadcast %cst_33 : f32 to vector<8x128xf32>
    %106 = arith.mulf %105, %98 : vector<8x128xf32>
    %107 = arith.mulf %106, %104 : vector<8x128xf32>
    %108 = arith.mulf %107, %104 : vector<8x128xf32>
    %cst_34 = arith.constant 2.000000e+00 : f32
    %109 = vector.broadcast %cst_34 : f32 to vector<8x128xf32>
    %110 = arith.addf %97, %109 : vector<8x128xf32>
    %111 = arith.mulf %110, %100 : vector<8x128xf32>
    %112 = arith.subf %108, %111 : vector<8x128xf32>
    %cst_35 = arith.constant 2.000000e+00 : f32
    %113 = vector.broadcast %cst_35 : f32 to vector<8x128xf32>
    %114 = arith.mulf %113, %100 : vector<8x128xf32>
    %115 = arith.mulf %114, %104 : vector<8x128xf32>
    %116 = tpu.reciprocal %112 {approx = true} : vector<8x128xf32> -> vector<8x128xf32>
    %117 = arith.mulf %115, %116 : vector<8x128xf32>
    %118 = arith.subf %97, %117 : vector<8x128xf32>
    %119 = math.exp %118 : vector<8x128xf32>
    %120 = arith.mulf %118, %119 : vector<8x128xf32>
    %121 = arith.subf %120, %37 : vector<8x128xf32>
    %cst_36 = arith.constant 1.000000e+00 : f32
    %122 = vector.broadcast %cst_36 : f32 to vector<8x128xf32>
    %123 = arith.addf %118, %122 : vector<8x128xf32>
    %cst_37 = arith.constant 9.99999974E-6 : f32
    %124 = vector.broadcast %cst_37 : f32 to vector<8x128xf32>
    %125 = arith.maximumf %123, %124 : vector<8x128xf32>
    %cst_38 = arith.constant 2.000000e+00 : f32
    %126 = vector.broadcast %cst_38 : f32 to vector<8x128xf32>
    %127 = arith.mulf %126, %119 : vector<8x128xf32>
    %128 = arith.mulf %127, %125 : vector<8x128xf32>
    %129 = arith.mulf %128, %125 : vector<8x128xf32>
    %cst_39 = arith.constant 2.000000e+00 : f32
    %130 = vector.broadcast %cst_39 : f32 to vector<8x128xf32>
    %131 = arith.addf %118, %130 : vector<8x128xf32>
    %132 = arith.mulf %131, %121 : vector<8x128xf32>
    %133 = arith.subf %129, %132 : vector<8x128xf32>
    %cst_40 = arith.constant 2.000000e+00 : f32
    %134 = vector.broadcast %cst_40 : f32 to vector<8x128xf32>
    %135 = arith.mulf %134, %121 : vector<8x128xf32>
    %136 = arith.mulf %135, %125 : vector<8x128xf32>
    %137 = tpu.reciprocal %133 {approx = true} : vector<8x128xf32> -> vector<8x128xf32>
    %138 = arith.mulf %136, %137 : vector<8x128xf32>
    %139 = arith.subf %118, %138 : vector<8x128xf32>
    %140 = arith.select %35, %33, %139 : vector<8x128xi1>, vector<8x128xf32>
    %cst_41 = arith.constant 0.000000e+00 : f32
    %141 = vector.broadcast %cst_41 : f32 to vector<8x128xf32>
    %142 = arith.subf %141, %140 : vector<8x128xf32>
    %143 = math.exp %142 : vector<8x128xf32>
    %cst_42 = arith.constant 2.30258512 : f32
    %144 = vector.broadcast %cst_42 : f32 to vector<8x128xf32>
    %145 = arith.subf %3, %144 : vector<8x128xf32>
    %146 = arith.mulf %145, %143 : vector<8x128xf32>
    %147 = arith.mulf %140, %140 : vector<8x128xf32>
    %cst_43 = arith.constant 2.500000e-01 : f32
    %148 = vector.broadcast %cst_43 : f32 to vector<8x128xf32>
    %149 = arith.mulf %148, %147 : vector<8x128xf32>
    %150 = arith.addf %146, %149 : vector<8x128xf32>
    %151 = tpu.iota {dimensions = array<i32: 0>} : vector<8x128xi32>
    %152 = tpu.iota {dimensions = array<i32: 1>} : vector<8x128xi32>
    %c8_i32 = arith.constant 8 : i32
    %153 = arith.muli %arg0, %c8_i32 : i32
    %154 = vector.broadcast %153 : i32 to vector<8x128xi32>
    %155 = arith.addi %154, %151 : vector<8x128xi32>
    %c128_i32 = arith.constant 128 : i32
    %156 = vector.broadcast %c128_i32 : i32 to vector<8x128xi32>
    %157 = arith.muli %155, %156 : vector<8x128xi32>
    %158 = arith.addi %157, %152 : vector<8x128xi32>
    %c64_i32 = arith.constant 64 : i32
    %159 = vector.broadcast %c64_i32 : i32 to vector<8x128xi32>
    %160 = arith.cmpi slt, %158, %159 : vector<8x128xi32>
    %cst_44 = arith.constant 0.000000e+00 : f32
    %161 = vector.broadcast %cst_44 : f32 to vector<8x128xf32>
    %162 = arith.select %160, %150, %161 : vector<8x128xi1>, vector<8x128xf32>
    %163 = vector.shape_cast %162 : vector<8x128xf32> to vector<1x8x128xf32>
    %cst_45 = arith.constant dense<0.000000e+00> : vector<8x128xf32>
    %164 = vector.multi_reduction <add>, %163, %cst_45 [0] : vector<1x8x128xf32> to vector<8x128xf32>
    %c0_46 = arith.constant 0 : index
    %c0_47 = arith.constant 0 : index
    %165 = vector.load %arg3[%c0_46, %c0_47] : memref<8x128xf32, #tpu.memory_space<vmem>>, vector<8x128xf32>
    %166 = arith.addf %165, %164 : vector<8x128xf32>
    %c0_48 = arith.constant 0 : index
    %c0_49 = arith.constant 0 : index
    %167 = vector.load %arg3[%c0_48, %c0_49] : memref<8x128xf32, #tpu.memory_space<vmem>>, vector<8x128xf32>
    tpu.vector_store %arg3[%c0_48, %c0_49], %166 {strides = array<i32>} : memref<8x128xf32, #tpu.memory_space<vmem>>, vector<8x128xf32>,
    %c0_i32_50 = arith.constant 0 : i32
    %168 = arith.cmpi eq, %arg0, %c0_i32_50 : i32
    %169 = arith.extui %168 : i1 to i32
    %c0_i32_51 = arith.constant 0 : i32
    %170 = arith.cmpi ne, %169, %c0_i32_51 : i32
    scf.if %170 {
      %c0_52 = arith.constant 0 : index
      %c0_53 = arith.constant 0 : index
      %171 = vector.load %arg3[%c0_52, %c0_53] : memref<8x128xf32, #tpu.memory_space<vmem>>, vector<8x128xf32>
      %172 = vector.shape_cast %171 : vector<8x128xf32> to vector<1x8x128xf32>
      %cst_54 = arith.constant dense<0.000000e+00> : vector<1xf32>
      %173 = vector.multi_reduction <add>, %172, %cst_54 [1, 2] : vector<1x8x128xf32> to vector<1xf32>
      %174 = vector.shape_cast %173 : vector<1xf32> to vector<1x1x1xf32>
      %175 = vector.extract %174[0, 0, 0] : f32 from vector<1x1x1xf32>
      %cst_55 = arith.constant 1.562500e-02 : f32
      %176 = arith.mulf %175, %cst_55 : f32
      %c0_56 = arith.constant 0 : index
      %c0_57 = arith.constant 0 : index
      %177 = memref.load %arg2[%c0_56, %c0_57] : memref<1x1xf32, #tpu.memory_space<smem>>
      memref.store %176, %arg2[%c0_56, %c0_57] : memref<1x1xf32, #tpu.memory_space<smem>>
    } else {
    }
    return
  }
  func.func @transform_0(%arg0: i32) -> (i32, i32) {
    %c0_i32 = arith.constant 0 : i32
    %c0_i32_0 = arith.constant 0 : i32
    return %arg0, %c0_i32 : i32, i32
  }
  func.func @transform_1(%arg0: i32) -> (i32, i32) {
    %c0_i32 = arith.constant 0 : i32
    %c0_i32_0 = arith.constant 0 : i32
    %c0_i32_1 = arith.constant 0 : i32
    return %c0_i32, %c0_i32_0 : i32, i32
  }
}

</mosaic_0001>

<bundles_post_ra>
// kernel: tpu_custom_call.1
= control target key start
LH: loop header
LB: loop body
LE: loop exit
PB: predicated region body
PF: predicated region fallthrough
CT: control target
= control target key end

     0   :  { %6 = vsyncpa [#allocation4], 0  ;;  %s323_s0 = inlined_call_operand.hbm [shape: f32[8,128], index: 0, kind: input, shape index: {}]   ;;  %s324_s1 = inlined_call_operand.hbm [shape: f32[1,1], index: 1, kind: output, shape index: {}]  }
   0x1   :  { %7 = vsyncpa [#allocation5], 0  ;;  %s259_s6 = smov [#allocation3]   ;;  %s223_s10 = scalar_lea.hbm %s323_s0, 128 }
   0x2   :  { %s14_s7 = sshll.u32 %s259_s6, 4  ;;  %p224_p0 = scmp.ne.s32.totalorder %s323_s0, %s223_s10  ;;  %s15_s7 = int_to_ptr.vmem [resolvable:$true] %s14_s7 }
   0x3   :  { %p227_p1 = scmp.lt.u32.totalorder %s223_s10, %s323_s0 }
   0x5   :  { %p229_p2 = pnand %p227_p1, %p224_p0 }
   0x7   :  { %232 = shalt.err (!%p229_p2)
}
   0x8   :  { %s233_s15 = scalar_lea.vmem %s15_s7, 128  ;;  %p238_p4 = scmp.lt.s32.totalorder %s15_s7, %s15_s7 }
   0x9   :  { %p234_p3 = scmp.ne.s32.totalorder %s15_s7, %s233_s15  ;;  %p239_p5 = scmp.lt.s32.totalorder %s233_s15, %s233_s15 }
   0xb   :  { %p240_p6 = por %p239_p5, %p238_p4 }
   0xd   :  { %p241_p7 = pnand %p240_p6, %p234_p3 }
   0xf   :  { %244 = shalt.err (!%p241_p7)
}
  0x10   :  { %17 = dma.hbm_to_vmem [thread:$0]  %s323_s0, 128, %s15_s7, [#allocation4]  }
  0x11   :  { %255 = dma.done.wait [#allocation4], 128  }
  0x12   :  { %256 = vsyncadd [#allocation4], 4294967168  ;;  %v26_v0 = vld [vmem:[#allocation3] sm:$0xff]  ;;  %s245_s21 = scalar_lea.hbm %s324_s1, 16 }
  0x13   :  { %v283_v1 = vadd.f32 -2.3025851, %v26_v0  ;;  %p246_p8 = scmp.ne.s32.totalorder %s324_s1, %s245_s21  ;;  %p249_p9 = scmp.lt.u32.totalorder %s245_s21, %s324_s1 }
  0x15   :  { %v28_v2 = vmul.f32 4.0, %v283_v1  ;;  %p251_p10 = pnand %p249_p9, %p246_p8 }
  0x17   :  { %v29_v3 = vmax.f32 %v28_v2, -0.7357589 }
  0x19   :  { %v286_v4 = vmul.f32 0.5, %v29_v3 }
  0x1b   :  { %v31_v5 = vmul.f32 2.7182817, %v286_v4  ;;  %vm50_vm0 = vcmp.lt.f32.partialorder %v286_v4, -0.36777943 }
  0x1c   :  { %v293_v6 = vsel %vm50_vm0, 0.0, %v286_v4 }
  0x1d   :  { %v32_v7 = vadd.f32 1.0, %v31_v5  ;;  %v52_v8 = vmax.f32 %v293_v6, 1e-06  ;;  %v62_v11 = vadd.f32 1.0, %v293_v6  ;;  %vm66_vm3 = vcmp.gt.f32.partialorder %v293_v6, 3.0 }
  0x1e   :  { %vm65_vm4 = vcmp.lt.f32.partialorder %v293_v6, -0.25 }
  0x1f   :  { %v33_v9 = vmul.f32 2.0, %v32_v7  ;;  %195 = vlog2.f32 %v52_v8 }
  0x21   :  { %v34_v10 = vmax.f32 %v33_v9, 0.0 }
  0x23   :  { %197 = vrsqrt.f32 %v34_v10  ;;  %vm37_vm1 = vcmp.eq.f32.partialorder %v34_v10, inf  ;;  %v40_v16 = vand.u32 2147483648, %v34_v10  ;;  %vm39_vm2 = vcmp.eq.f32.partialorder %v34_v10, 0.0 }
  0x24   :  { %199 = vrcp.f32 %v62_v11 }
  0x29   :  { %v196_v12 = vpop.eup %195 }
  0x2a   :  { %v54_v13 = vmul.f32 0.6931472, %v196_v12 }
  0x2c   :  { %v55_v14 = vmax.f32 %v54_v13, 1e-06  ;;  %201 = vrcp.f32 %v54_v13 }
  0x2d   :  { %v198_v15 = vpop.eup %197 }
  0x2e   :  { %v36_v17 = vmul.f32 %v198_v15, %v34_v10  ;;  %203 = vlog2.f32 %v55_v14  ;;  %v200_v22 = vpop.eup %199 }
  0x2f   :  { %v64_v31 = vmul.f32 %v200_v22, %v293_v6 }
  0x30   :  { %v38_v18 = vsel %vm37_vm1, %v34_v10, %v36_v17 }
  0x31   :  { %v41_v19 = vsel %vm39_vm2, %v40_v16, %v38_v18 }
  0x32   :  { %v42_v20 = vmul.f32 -0.07962963, %v41_v19 }
  0x34   :  { %v43_v21 = vadd.f32 0.15277778, %v42_v20 }
  0x36   :  { %v44_v23 = vmul.f32 %v43_v21, %v41_v19  ;;  %v202_v24 = vpop.eup %201 }
  0x38   :  { %v204_v25 = vpop.eup %203  ;;  %v45_v26 = vadd.f32 -0.33333334, %v44_v23 }
  0x39   :  { %v57_v27 = vmul.f32 0.6931472, %v204_v25 }
  0x3a   :  { %v46_v28 = vmul.f32 %v45_v26, %v41_v19 }
  0x3b   :  { %v58_v29 = vsub.f32 %v54_v13, %v57_v27  ;;  %v60_v30 = vmul.f32 %v202_v24, %v57_v27 }
  0x3c   :  { %v47_v32 = vadd.f32 1.0, %v46_v28 }
  0x3d   :  { %v61_v33 = vadd.f32 %v60_v30, %v58_v29 }
  0x3e   :  { %v48_v34 = vmul.f32 %v47_v32, %v41_v19 }
  0x3f   :  { %v67_v35 = vsel %vm66_vm3, %v61_v33, %v64_v31 }
  0x40   :  { %v300_v36 = vadd.f32 -1.0, %v48_v34 }
  0x42   :  { %v68_v37 = vsel %vm65_vm4, %v300_v36, %v67_v35 }
  0x43   :  { %v69_v38 = vmul.f32 1.442695, %v68_v37  ;;  %v73_v39 = vadd.f32 1.0, %v68_v37  ;;  %v78_v44 = vadd.f32 2.0, %v68_v37 }
  0x45   :  { %205 = vpow2.f32 %v69_v38  ;;  %v74_v40 = vmax.f32 %v73_v39, 1e-05 }
  0x4f   :  { %v206_v41 = vpop.eup %205 }
  0x50   :  { %v71_v42 = vmul.f32 %v206_v41, %v68_v37  ;;  %v75_v43 = vmul.f32 2.0, %v206_v41 }
  0x52   :  { %v72_v45 = vsub.f32 %v71_v42, %v293_v6  ;;  %v76_v46 = vmul.f32 %v75_v43, %v74_v40 }
  0x54   :  { %v77_v47 = vmul.f32 %v76_v46, %v74_v40  ;;  %v79_v48 = vmul.f32 %v78_v44, %v72_v45  ;;  %v81_v50 = vmul.f32 2.0, %v72_v45 }
  0x56   :  { %v80_v49 = vsub.f32 %v77_v47, %v79_v48  ;;  %v82_v51 = vmul.f32 %v81_v50, %v74_v40  ;;  %v145_v48 = vlaneseq }
  0x58   :  { %207 = vrcp.f32 %v80_v49  ;;  %v146_v50 = vshrl.u32 %v145_v48, 7 }
  0x62   :  { %v208_v52 = vpop.eup %207 }
  0x63   :  { %v84_v53 = vmul.f32 %v208_v52, %v82_v51  ;;  %v152_v51 = vmul.u32 128, %v146_v50 }
  0x65   :  { %v85_v54 = vsub.f32 %v68_v37, %v84_v53 }
  0x67   :  { %v86_v55 = vmul.f32 1.442695, %v85_v54  ;;  %v90_v56 = vadd.f32 1.0, %v85_v54  ;;  %v95_v61 = vadd.f32 2.0, %v85_v54 }
  0x69   :  { %209 = vpow2.f32 %v86_v55  ;;  %v91_v57 = vmax.f32 %v90_v56, 1e-05 }
  0x73   :  { %v210_v58 = vpop.eup %209 }
  0x74   :  { %v88_v59 = vmul.f32 %v210_v58, %v85_v54  ;;  %v92_v60 = vmul.f32 2.0, %v210_v58 }
  0x76   :  { %v89_v62 = vsub.f32 %v88_v59, %v293_v6  ;;  %v93_v63 = vmul.f32 %v92_v60, %v91_v57 }
  0x78   :  { %v94_v0 = vmul.f32 %v93_v63, %v91_v57  ;;  %v96_v2 = vmul.f32 %v95_v61, %v89_v62  ;;  %v98_v5 = vmul.f32 2.0, %v89_v62 }
  0x7a   :  { %v97_v3 = vsub.f32 %v94_v0, %v96_v2  ;;  %v99_v7 = vmul.f32 %v98_v5, %v91_v57 }
  0x7c   :  { %211 = vrcp.f32 %v97_v3 }
  0x86   :  { %v212_v8 = vpop.eup %211 }
  0x87   :  { %v101_v9 = vmul.f32 %v212_v8, %v99_v7 }
  0x89   :  { %v102_v10 = vsub.f32 %v85_v54, %v101_v9 }
  0x8b   :  { %v103_v11 = vmul.f32 1.442695, %v102_v10  ;;  %v107_v12 = vadd.f32 1.0, %v102_v10  ;;  %v112_v17 = vadd.f32 2.0, %v102_v10 }
  0x8d   :  { %213 = vpow2.f32 %v103_v11  ;;  %v108_v13 = vmax.f32 %v107_v12, 1e-05 }
  0x97   :  { %v214_v14 = vpop.eup %213 }
  0x98   :  { %v105_v15 = vmul.f32 %v214_v14, %v102_v10  ;;  %v109_v16 = vmul.f32 2.0, %v214_v14 }
  0x9a   :  { %v106_v18 = vsub.f32 %v105_v15, %v293_v6  ;;  %v110_v19 = vmul.f32 %v109_v16, %v108_v13 }
  0x9c   :  { %v111_v20 = vmul.f32 %v110_v19, %v108_v13  ;;  %v113_v21 = vmul.f32 %v112_v17, %v106_v18  ;;  %v115_v23 = vmul.f32 2.0, %v106_v18 }
  0x9e   :  { %v114_v22 = vsub.f32 %v111_v20, %v113_v21  ;;  %v116_v24 = vmul.f32 %v115_v23, %v108_v13 }
  0xa0   :  { %215 = vrcp.f32 %v114_v22 }
  0xaa   :  { %v216_v25 = vpop.eup %215 }
  0xab   :  { %v118_v26 = vmul.f32 %v216_v25, %v116_v24 }
  0xad   :  { %v119_v27 = vsub.f32 %v102_v10, %v118_v26 }
  0xaf   :  { %v120_v28 = vmul.f32 1.442695, %v119_v27  ;;  %v124_v29 = vadd.f32 1.0, %v119_v27  ;;  %v129_v34 = vadd.f32 2.0, %v119_v27 }
  0xb1   :  { %217 = vpow2.f32 %v120_v28  ;;  %v125_v30 = vmax.f32 %v124_v29, 1e-05 }
  0xbb   :  { %v218_v31 = vpop.eup %217 }
  0xbc   :  { %v122_v32 = vmul.f32 %v218_v31, %v119_v27  ;;  %v126_v33 = vmul.f32 2.0, %v218_v31 }
  0xbe   :  { %v123_v35 = vsub.f32 %v122_v32, %v293_v6  ;;  %v127_v37 = vmul.f32 %v126_v33, %v125_v30  ;;  %v148_v6 = vand.u32 127, %v145_v48 }
  0xc0   :  { %v128_v38 = vmul.f32 %v127_v37, %v125_v30  ;;  %v130_v39 = vmul.f32 %v129_v34, %v123_v35  ;;  %v132_v41 = vmul.f32 2.0, %v123_v35  ;;  %v153_v53 = vadd.s32 %v152_v51, %v148_v6 }
  0xc2   :  { %v131_v40 = vsub.f32 %v128_v38, %v130_v39  ;;  %v133_v42 = vmul.f32 %v132_v41, %v125_v30  ;;  %vm154_vm5 = vcmp.lt.s32.totalorder %v153_v53, 64 }
  0xc4   :  { %219 = vrcp.f32 %v131_v40 }
  0xce   :  { %v220_v43 = vpop.eup %219 }
  0xcf   :  { %v135_v44 = vmul.f32 %v220_v43, %v133_v42 }
  0xd1   :  { %v136_v45 = vsub.f32 %v119_v27, %v135_v44 }
  0xd3   :  { %v137_v46 = vsel %vm50_vm0, %v300_v36, %v136_v45 }
  0xd4   :  { %v138_v47 = vsub.f32 0.0, %v137_v46  ;;  %v142_v52 = vmul.f32 %v137_v46, %v137_v46 }
  0xd6   :  { %v139_v49 = vmul.f32 1.442695, %v138_v47  ;;  %v143_v54 = vmul.f32 0.25, %v142_v52 }
  0xd8   :  { %221 = vpow2.f32 %v139_v49 }
  0xe2   :  { %v222_v55 = vpop.eup %221 }
  0xe3   :  { %v141_v56 = vmul.f32 %v222_v55, %v283_v1 }
  0xe5   :  { %v144_v57 = vadd.f32 %v143_v54, %v141_v56 }
  0xe7   :  { %v155_v58 = vsel %vm154_vm5, %v144_v57, 0.0 }
  0xe8   :  { %164 = vadd.xlane.f32.xlu0 %v155_v58 }
 0x175   :  { %v165_v59 = vpop.xlane.xlu0 %164 }
 0x176   :  { %v166_v4 = vrot.slane %v165_v59, 4 }
 0x178   :  { %v167_v36 = vadd.f32 %v166_v4, %v165_v59 }
 0x17a   :  { %v168_v60 = vrot.slane %v167_v36, 2 }
 0x17c   :  { %v169_v61 = vadd.f32 %v168_v60, %v167_v36 }
 0x17e   :  { %v170_v62 = vrot.slane %v169_v61, 1 }
 0x180   :  { %v171_v63 = vadd.f32 %v170_v62, %v169_v61 }
 0x182   :  { %191 = vpush %v171_v63 }
 0x1b3   :  { %s192_s0 = spop %191 }
 0x1b4   :  { %s173_s18 = smul.f32 0.015625, %s192_s0 }
 0x1b6   :  { %175 = sst [smem:[#allocation6]] %s173_s18 }
 0x1b7   :  { %254 = shalt.err (!%p251_p10)
}
 0x1b8   :  { %s260_s26 = smov [#allocation6]  }
 0x1b9   :  { %183 = dma.smem_to_hbm %s260_s26, 16, %s324_s1, [#allocation5]  }
 0x1ba   :  { %257 = dma.done.wait [#allocation5], 16  }
 0x1bb   :  { %258 = vsyncadd [#allocation5], 4294967280 }
 0x1bc   :  { %187 = sfence }
 0x1bd   :  { %188 = vsyncpa [#allocation4], 1 }
 0x1be   :  { %189 = vsyncpa [#allocation5], 1 }

</bundles_post_ra>
